<compile_context>
chip_gen: v5e
topology: v5e:2x2
jax: 0.10.0
libtpu: 0.0.40
codegen_flags: <defaults>
</compile_context>

<pallas_src>
import numpy as np
import jax
import jax.numpy as jnp
from jax.experimental import pallas as pl
from jax.experimental.pallas import tpu as pltpu


def _round_up(x, m):
    return (x + m - 1) // m * m


def _pad2d(a, rows, cols):
    r, c = a.shape
    if r == rows and c == cols:
        return a
    return jnp.pad(a, ((0, rows - r), (0, cols - c)))


def _vmem_capacity_bytes():
    # Generation-aware VMEM capacity (v5e/v6e: 128 MiB, v7x: 64 MiB per TC).
    try:
        cap = int(pltpu.get_tpu_info().vmem_capacity_bytes)
        if cap > 0:
            return cap
    except Exception:
        pass
    return 64 << 20  # conservative fallback (v7x per-TC size)


def _mlp_kernel(x_ref, w1_ref, b1_ref, w2_ref, b2_ref, o_ref, h_ref):
    """grid = (batch_tiles, hout_tiles).

    The ReLU'd hidden activation for the current batch tile is computed once
    (j == 0) into a bf16 VMEM scratch and reused for every W2 column tile.
    """
    @pl.when(pl.program_id(1) == 0)
    def _():
        # Cast x to the MXU operand dtype in-register (no bf16 copy of x in HBM).
        h = jnp.dot(x_ref[...].astype(w1_ref.dtype), w1_ref[...],
                    preferred_element_type=jnp.float32)
        # Bias + ReLU in f32 on the VPU; store hidden in the compute dtype.
        h_ref[...] = jnp.maximum(h + b1_ref[...], 0.0).astype(h_ref.dtype)

    y = jnp.dot(h_ref[...], w2_ref[...], preferred_element_type=jnp.float32)
    o_ref[...] = (y + b2_ref[...]).astype(o_ref.dtype)


def prepare_params(w1, b1, w2, b2, *, compute_dtype=jnp.bfloat16):
    """One-time weight transform (hoisted out of the per-call path).

    w1: [D_in, H]  (pre-transposed vs. torch's nn.Linear.weight)
    w2: [H, H],  b1/b2: [H] or [1, H].
    Pads the hidden dim to a multiple of 128 (lane-dense stores, full MXU
    tiles) and casts the MXU operands to compute_dtype (use jnp.float32 here
    if exact-f32 parity with torch matters); biases stay f32.
    """
    w1 = jnp.asarray(w1)
    w2 = jnp.asarray(w2)
    D_in, H = w1.shape
    H_pad = _round_up(max(H, 1), 128)
    return dict(
        w1=_pad2d(w1, D_in, H_pad).astype(compute_dtype),
        w2=_pad2d(w2, H_pad, H_pad).astype(compute_dtype),
        b1=_pad2d(jnp.asarray(b1).reshape(1, -1), 1, H_pad).astype(jnp.float32),
        b2=_pad2d(jnp.asarray(b2).reshape(1, -1), 1, H_pad).astype(jnp.float32),
        d_in=int(D_in), hidden=int(H), compute_dtype=np.dtype(compute_dtype),
    )


def feature_extractor_fwd(x, params, *, batch_tile=None):
    """Fused MLP forward: relu(x @ w1 + b1) @ w2 + b2  ->  [B, H] in x.dtype."""
    D_in, H = params["d_in"], params["hidden"]
    cdtype = params["compute_dtype"]
    w1p, b1p, w2p, b2p = params["w1"], params["b1"], params["w2"], params["b2"]
    H_pad = w1p.shape[1]
    B = x.shape[0]
    assert x.shape == (B, D_in)
    out_dtype = x.dtype

    # --- batch tile: multiple of 16 (bf16 sublane packing); for B >= 32 keep
    # at least ~4 grid steps so x/out DMA overlaps the MXU; cap at 512 rows.
    if batch_tile is None:
        if B < 32:
            batch_tile = _round_up(max(B, 1), 16)
        else:
            batch_tile = min(512, _round_up(pl.cdiv(B, 4), 16))
    batch_tile = _round_up(batch_tile, 16)
    B_pad = _round_up(B, batch_tile)

    # --- generation-aware VMEM sizing --------------------------------------
    cap = _vmem_capacity_bytes()
    usable = int(cap * 0.88)                       # headroom for compiler scratch
    cbytes = np.dtype(cdtype).itemsize
    xbytes = np.dtype(x.dtype).itemsize
    obytes = np.dtype(out_dtype).itemsize

    # W2 column tile: keep W2 fully resident (single-buffered) when it fits a
    # third of usable VMEM, otherwise stream double-buffered column tiles.
    w_budget = usable // 3
    if H_pad * H_pad * cbytes <= w_budget:
        tn = H_pad
    else:
        tn = max(128, min(H_pad, (w_budget // (2 * H_pad * cbytes)) // 128 * 128))
    n_hout = H_pad // tn

    est = (D_in * H_pad * cbytes                          # W1 (resident)
           + H_pad * 4 + tn * 4                           # b1, b2 (f32)
           + (1 if n_hout == 1 else 2) * H_pad * tn * cbytes   # W2 tile(s)
           + 2 * batch_tile * D_in * xbytes               # x tile, double-buffered
           + 2 * batch_tile * tn * obytes                 # out tile, double-buffered
           + batch_tile * H_pad * cbytes                  # hidden scratch
           + 2 * batch_tile * max(H_pad, tn) * 4)         # f32 matmul temporaries
    vmem_limit = int(min(max(2 * est, 32 << 20), usable))
    vmem_limit = max(vmem_limit, int(est) + (2 << 20))    # never clamp below need

    # Pad the batch only when required (no extra HBM round trip when aligned).
    xp = x if B_pad == B else jnp.pad(x, ((0, B_pad - B), (0, 0)))

    resident = dict(pipeline_mode=pl.Buffered(1))   # constant index_map -> 1 buffer
    w2_mode = resident if n_hout == 1 else {}       # streamed -> default 2 buffers

    grid = (B_pad // batch_tile, n_hout)

    # TODO(synk): on v7x, mark the batch axis pltpu.CORE_PARALLEL (2 TCs/chip)
    # when the grid has >= 2 batch steps; "parallel" kept for portability.
    out = pl.pallas_call(
        _mlp_kernel,
        out_shape=jax.ShapeDtypeStruct((B_pad, H_pad), out_dtype),
        grid_spec=pltpu.PrefetchScalarGridSpec(
            num_scalar_prefetch=0,
            grid=grid,
            in_specs=[
                pl.BlockSpec((batch_tile, D_in), lambda i, j: (i, 0)),         # x
                pl.BlockSpec((D_in, H_pad), lambda i, j: (0, 0), **resident),  # W1
                pl.BlockSpec((1, H_pad), lambda i, j: (0, 0), **resident),     # b1
                pl.BlockSpec((H_pad, tn), lambda i, j: (0, j), **w2_mode),     # W2
                pl.BlockSpec((1, tn), lambda i, j: (0, j), **w2_mode),         # b2
            ],
            out_specs=pl.BlockSpec((batch_tile, tn), lambda i, j: (i, j)),
            scratch_shapes=[pltpu.VMEM((batch_tile, H_pad), cdtype)],
        ),
        compiler_params=pltpu.CompilerParams(
            dimension_semantics=("parallel", "arbitrary"),
            vmem_limit_bytes=vmem_limit,
        ),
    )(xp, w1p, b1p, w2p, b2p)

    if B_pad != B or H_pad != H:
        out = out[:B, :H]
    return out


def feature_extractor(x, w1, b1, w2, b2, *, batch_tile=None,
                      compute_dtype=jnp.bfloat16):
    """One-shot convenience wrapper (prefer prepare_params + _fwd in a loop)."""
    return feature_extractor_fwd(
        x, prepare_params(w1, b1, w2, b2, compute_dtype=compute_dtype),
        batch_tile=batch_tile)


def _init_params(key, input_dim, hidden_dim, dtype=jnp.float32):
    # Deterministic synthetic init (Kaiming-uniform-ish like torch defaults).
    k1, k2, k3, k4 = jax.random.split(key, 4)
    bound1 = 1.0 / (input_dim ** 0.5)
    bound2 = 1.0 / (hidden_dim ** 0.5)
    w1 = jax.random.uniform(k1, (input_dim, hidden_dim), dtype, -bound1, bound1)
    b1 = jax.random.uniform(k2, (1, hidden_dim), dtype, -bound1, bound1)
    w2 = jax.random.uniform(k3, (hidden_dim, hidden_dim), dtype, -bound2, bound2)
    b2 = jax.random.uniform(k4, (1, hidden_dim), dtype, -bound2, bound2)
    return w1, b1, w2, b2


if __name__ == "__main__":
    key = jax.random.PRNGKey(0)
    kx, kp = jax.random.split(key)

    B, INPUT_DIM, HIDDEN_DIM = 32, 32, 64
    x = jax.random.normal(kx, (B, INPUT_DIM), dtype=jnp.float32)
    w1, b1, w2, b2 = _init_params(kp, INPUT_DIM, HIDDEN_DIM)

    # One-time weight pad/cast, hoisted out of the per-step path.
    params = prepare_params(w1, b1, w2, b2)
    fwd = jax.jit(lambda xx: feature_extractor_fwd(xx, params))

    # Default tile heuristic -> batch_tile=16 (bf16-native), grid=(2, 1): the
    # multi-step pipelined path is exercised.
    out = jax.block_until_ready(fwd(x))

    # Pure-JAX f32 reference.  Tolerance covers bf16 rounding of MXU operands
    # (K <= 128 here, so error is well under 5e-2).
    ref = jnp.maximum(x @ w1 + b1, 0.0) @ w2 + b2
    assert out.shape == (B, HIDDEN_DIM)
    assert out.dtype == x.dtype
    assert jnp.allclose(out, ref, atol=5e-2, rtol=5e-2), float(
        jnp.max(jnp.abs(out - ref)))

    print("KERNEL_OK")
</pallas_src>

<mosaic_0001>
module attributes {stable_mosaic.version = 11 : i64} {
  func.func @_mlp_kernel(%arg0: i32, %arg1: i32, %arg2: memref<16x32xf32, #tpu.memory_space<vmem>>, %arg3: memref<32x128xbf16, #tpu.memory_space<vmem>>, %arg4: memref<1x128xf32, #tpu.memory_space<vmem>>, %arg5: memref<128x128xbf16, #tpu.memory_space<vmem>>, %arg6: memref<1x128xf32, #tpu.memory_space<vmem>>, %arg7: memref<16x128xf32, #tpu.memory_space<vmem>>, %arg8: memref<16x128xbf16, #tpu.memory_space<vmem>>) attributes {dimension_semantics = [#tpu.dimension_semantics<parallel>, #tpu.dimension_semantics<arbitrary>], iteration_bounds = array<i64: 2, 1>, scalar_prefetch = 0 : i64, scratch_operands = 1 : i64, tpu.core_type = #tpu.core_type<tc>, window_params = [{transform_indices = @transform_0, window_bounds = array<i64: 16, 32>}, {pipeline_mode = #tpu.pipeline_mode<synchronous>, transform_indices = @transform_1, window_bounds = array<i64: 32, 128>}, {pipeline_mode = #tpu.pipeline_mode<synchronous>, transform_indices = @transform_2, window_bounds = array<i64: 1, 128>}, {pipeline_mode = #tpu.pipeline_mode<synchronous>, transform_indices = @transform_3, window_bounds = array<i64: 128, 128>}, {pipeline_mode = #tpu.pipeline_mode<synchronous>, transform_indices = @transform_4, window_bounds = array<i64: 1, 128>}, {transform_indices = @transform_5, window_bounds = array<i64: 16, 128>}]} {
    %c0_i32 = arith.constant 0 : i32
    %0 = arith.cmpi eq, %arg1, %c0_i32 : i32
    %1 = arith.extui %0 : i1 to i32
    %c0_i32_0 = arith.constant 0 : i32
    %2 = arith.cmpi ne, %1, %c0_i32_0 : i32
    scf.if %2 {
      %c0_8 = arith.constant 0 : index
      %c0_9 = arith.constant 0 : index
      %10 = vector.load %arg2[%c0_8, %c0_9] : memref<16x32xf32, #tpu.memory_space<vmem>>, vector<16x32xf32>
      %11 = arith.truncf %10 : vector<16x32xf32> to vector<16x32xbf16>
      %c0_10 = arith.constant 0 : index
      %c0_11 = arith.constant 0 : index
      %12 = vector.load %arg3[%c0_10, %c0_11] : memref<32x128xbf16, #tpu.memory_space<vmem>>, vector<32x128xbf16>
      %cst_12 = arith.constant dense<0.000000e+00> : vector<16x128xf32>
      %13 = tpu.matmul %11, %12, %cst_12 {dimension_numbers = #tpu.dot_dimension_numbers<[1], [0], [0], [1], [0, 0, 1, 1], [], []>} : vector<16x32xbf16>, vector<32x128xbf16>, vector<16x128xf32> -> vector<16x128xf32>
      %c0_13 = arith.constant 0 : index
      %c0_14 = arith.constant 0 : index
      %14 = vector.load %arg4[%c0_13, %c0_14] : memref<1x128xf32, #tpu.memory_space<vmem>>, vector<1x128xf32>
      %15 = vector.broadcast %14 : vector<1x128xf32> to vector<16x128xf32>
      %16 = arith.addf %13, %15 : vector<16x128xf32>
      %cst_15 = arith.constant 0.000000e+00 : f32
      %17 = vector.broadcast %cst_15 : f32 to vector<16x128xf32>
      %18 = arith.maximumf %16, %17 : vector<16x128xf32>
      %19 = arith.truncf %18 : vector<16x128xf32> to vector<16x128xbf16>
      %c0_16 = arith.constant 0 : index
      %c0_17 = arith.constant 0 : index
      %20 = vector.load %arg8[%c0_16, %c0_17] : memref<16x128xbf16, #tpu.memory_space<vmem>>, vector<16x128xbf16>
      tpu.vector_store %arg8[%c0_16, %c0_17], %19 {strides = array<i32>} : memref<16x128xbf16, #tpu.memory_space<vmem>>, vector<16x128xbf16>,
    } else {
    }
    %c0 = arith.constant 0 : index
    %c0_1 = arith.constant 0 : index
    %3 = vector.load %arg8[%c0, %c0_1] : memref<16x128xbf16, #tpu.memory_space<vmem>>, vector<16x128xbf16>
    %c0_2 = arith.constant 0 : index
    %c0_3 = arith.constant 0 : index
    %4 = vector.load %arg5[%c0_2, %c0_3] : memref<128x128xbf16, #tpu.memory_space<vmem>>, vector<128x128xbf16>
    %cst = arith.constant dense<0.000000e+00> : vector<16x128xf32>
    %5 = tpu.matmul %3, %4, %cst {dimension_numbers = #tpu.dot_dimension_numbers<[1], [0], [0], [1], [0, 0, 1, 1], [], []>} : vector<16x128xbf16>, vector<128x128xbf16>, vector<16x128xf32> -> vector<16x128xf32>
    %c0_4 = arith.constant 0 : index
    %c0_5 = arith.constant 0 : index
    %6 = vector.load %arg6[%c0_4, %c0_5] : memref<1x128xf32, #tpu.memory_space<vmem>>, vector<1x128xf32>
    %7 = vector.broadcast %6 : vector<1x128xf32> to vector<16x128xf32>
    %8 = arith.addf %5, %7 : vector<16x128xf32>
    %c0_6 = arith.constant 0 : index
    %c0_7 = arith.constant 0 : index
    %9 = vector.load %arg7[%c0_6, %c0_7] : memref<16x128xf32, #tpu.memory_space<vmem>>, vector<16x128xf32>
    tpu.vector_store %arg7[%c0_6, %c0_7], %8 {strides = array<i32>} : memref<16x128xf32, #tpu.memory_space<vmem>>, vector<16x128xf32>,
    return
  }
  func.func @transform_0(%arg0: i32, %arg1: i32) -> (i32, i32) {
    %c0_i32 = arith.constant 0 : i32
    %c0_i32_0 = arith.constant 0 : i32
    return %arg0, %c0_i32 : i32, i32
  }
  func.func @transform_1(%arg0: i32, %arg1: i32) -> (i32, i32) {
    %c0_i32 = arith.constant 0 : i32
    %c0_i32_0 = arith.constant 0 : i32
    %c0_i32_1 = arith.constant 0 : i32
    return %c0_i32, %c0_i32_0 : i32, i32
  }
  func.func @transform_2(%arg0: i32, %arg1: i32) -> (i32, i32) {
    %c0_i32 = arith.constant 0 : i32
    %c0_i32_0 = arith.constant 0 : i32
    %c0_i32_1 = arith.constant 0 : i32
    return %c0_i32, %c0_i32_0 : i32, i32
  }
  func.func @transform_3(%arg0: i32, %arg1: i32) -> (i32, i32) {
    %c0_i32 = arith.constant 0 : i32
    %c0_i32_0 = arith.constant 0 : i32
    return %c0_i32, %arg1 : i32, i32
  }
  func.func @transform_4(%arg0: i32, %arg1: i32) -> (i32, i32) {
    %c0_i32 = arith.constant 0 : i32
    %c0_i32_0 = arith.constant 0 : i32
    return %c0_i32, %arg1 : i32, i32
  }
  func.func @transform_5(%arg0: i32, %arg1: i32) -> (i32, i32) {
    %c0_i32 = arith.constant 0 : i32
    return %arg0, %arg1 : i32, i32
  }
}

</mosaic_0001>

<bundles_post_ra>
// kernel: _lambda_.1
= control target key start
LH: loop header
LB: loop body
LE: loop exit
PB: predicated region body
PF: predicated region fallthrough
CT: control target
= control target key end

     0   :  { %s1230_s0 = inlined_call_operand.hbm [shape: f32[32,32], index: 0, kind: input, shape index: {}]   ;;  %s1231_s1 = inlined_call_operand.hbm [shape: bf16[32,128], index: 1, kind: input, shape index: {}]   ;;  %s1232_s2 = inlined_call_operand.hbm [shape: f32[1,128], index: 2, kind: input, shape index: {}]   ;;  %s1233_s3 = inlined_call_operand.hbm [shape: bf16[128,128], index: 3, kind: input, shape index: {}]   ;;  %s1234_s4 = inlined_call_operand.vmem [shape: f32[1,128], index: 4, kind: input, shape index: {}]   ;;  %s1235_s5 = inlined_call_operand.hbm [shape: f32[32,128], index: 5, kind: output, shape index: {}]  }
   0x1   :  { %1236 = sst [smem:[#allocation16_spill]] %s1231_s1 }
   0x2   :  { %1237 = sst [smem:[#allocation17_spill]] %s1232_s2 }
   0x3   :  { %1238 = sst [smem:[#allocation18_spill]] %s1233_s3 }
   0x4   :  { %10 = vsyncpa [#allocation4], 0 }
   0x5   :  { %12 = vsyncpa [#allocation4 + $0x1], 0 }
   0x6   :  { %13 = vsyncpa [#allocation7], 0 }
   0x7   :  { %14 = vsyncpa [#allocation10], 0 }
   0x8   :  { %15 = vsyncpa [#allocation5], 0 }
   0x9   :  { %17 = vsyncpa [#allocation5 + $0x1], 0  ;;  %s1054_s18 = smov 0   ;;  %s1056_s19 = smov 0  }
   0xa   :  { %s1058_s20 = smov 0   ;;  %s1060_s21 = smov 0  }
   0xb   :  { %s1062_s22 = smov 0   ;;  %s1064_s23 = smov 0  }
   0xc LB: > { %s617_s24 = sadd.s32 4294967295, %s1013_s23   ;;  %s618_s25 = sadd.s32 4294967294, %s1013_s23   ;;  %s1013_s23 = sphi %s1064_s23, %s23_s23   ;;  %s1009_s22 = sphi %s1062_s22, %s1254_s22   ;;  %s1005_s21 = sphi %s1060_s21, %s1253_s21   ;;  %s1001_s20 = sphi %s1058_s20, %s1252_s20   ;;  %s997_s19 = sphi %s1056_s19, %s1251_s19   ;;  %s993_s18 = sphi %s1054_s18, %s1250_s18  }
   0xd   : > { %p55_p0 = scmp.ne.s32.totalorder %s997_s19, %s993_s18  ;;  %p1088_p1 = scmp.eq.s32.totalorder %s617_s24, 0 }
   0xe   : > { %p1092_p2 = scmp.eq.s32.totalorder %s617_s24, 1  ;;  %p181_p3 = scmp.eq.s32.totalorder %s618_s25, 1 }
   0xf   : > { %p1098_p4 = por %p1088_p1, %p55_p0  ;;  %p619_p5 = scmp.ge.s32.totalorder %s1013_s23, 1 }
  0x10   : > { %p1103_p6 = por %p181_p3, %p55_p0  ;;  %p188_p7 = scmp.lt.s32.totalorder %s1013_s23, 3 }
  0x11   : > { %s1243_s1 = sld [smem:[#allocation16_spill]]  ;;  %s1015_s9 = smov [#allocation6]  }
  0x12   : > { %p1111_p8 = pnand %p619_p5, %p188_p7  ;;  %s201_s10 = sshll.u32 %s1015_s9, 4  ;;  %s202_s10 = int_to_ptr.vmem [resolvable:$true] %s201_s10 }
  0x13   : > { %p624_p11 = scmp.ge.s32.totalorder %s1013_s23, 2  ;;  %s1246_s2 = sld [smem:[#allocation17_spill]] }
  0x14   : > { %p718_p9 = pneg %p1111_p8  ;;  %s1016_s15 = smov 64  }
  0x15   : > { %s1017_s16 = smov 4   ;;  %s1018_s17 = smov [#allocation8]  }
  0x16   : > { %p1119_p10 = pnand %p718_p9, %p1088_p1  ;;  %s216_s24 = sshll.u32 %s1018_s17, 4  ;;  %s217_s24 = int_to_ptr.vmem [resolvable:$true] %s216_s24 }
  0x17   : > { %s199_s7 = sshll.u32 %s1243_s1, 4  ;;  %s1247_s3 = sld [smem:[#allocation18_spill]]  ;;  %s200_s7 = int_to_ptr.hbm [resolvable:$true] %s199_s7 }
  0x18   : > { %721 = dma.hbm_to_vmem [thread:$0]  (!%p1119_p10), %s200_s7, 256, %s202_s10, [#allocation7], %s1016_s15, %s1016_s15, %s1017_s16  }
  0x19   : > { %s214_s14 = sshll.u32 %s1246_s2, 4  ;;  %s1019_s9 = smov [#allocation9]   ;;  %s215_s14 = int_to_ptr.hbm [resolvable:$true] %s214_s14 }
  0x1a   : > { %724 = dma.hbm_to_vmem [thread:$0]  (!%p1119_p10), %s215_s14, 16, %s217_s24, [#allocation7]  }
  0x1b   : > { %s229_s12 = sshll.u32 %s1019_s9, 4  ;;  %s35_s7 = sadd.s32 1, %s1009_s22  ;;  %s230_s12 = int_to_ptr.vmem [resolvable:$true] %s229_s12 }
  0x1c   : > { %p37_p12 = scmp.ge.s32.totalorder %s35_s7, 2  ;;  %s42_s10 = sadd.s32 1, %s1001_s20 }
  0x1d   : > { %s227_s6 = sshll.u32 %s1247_s3, 4  ;;  %p49_p13 = scmp.ne.s32.totalorder %s1001_s20, %s997_s19  ;;  %s228_s6 = int_to_ptr.hbm [resolvable:$true] %s227_s6 }
  0x1e   : > { %727 = dma.hbm_to_vmem [thread:$0]  (!%p1119_p10), %s228_s6, 1024, %s230_s12, [#allocation10], %s1016_s15, %s1016_s15, %s1017_s16  }
  0x1f   : > { %p50_p0 = scmp.eq.s32.totalorder %s1013_s23, 0  ;;  %s1256_s7 = smov (%p37_p12, %s35_s7), 0 }
  0x20   : > { %p1149_p5 = por %p1092_p2, %p49_p13  ;;  %s39_s11 = ssub.s32 %s1009_s22, %s1256_s7 }
  0x21   : > { %p1143_p3 = por %p50_p0, %p49_p13  ;;  %p739_p7 = scmp.lt.s32.totalorder %s1013_s23, 2 }
  0x22   : > { %p40_p9 = scmp.eq.s32.totalorder %s39_s11, 0  ;;  %s249_s15 = sand.u32 1, %s1001_s20  }
  0x23   : > { %s625_s16 = sshll.u32 %s249_s15, 4  ;;  %s684_s24 = sshll.u32 %s1009_s22, 4 }
  0x24   : > { %s1158_s17 = scalar_select %p40_p9, %s1001_s20, %s42_s10  }
  0x25   : > { %s258_s6 = scalar_lea.hbm %s1230_s0, %s684_s24  ;;  %s253_s9 = scalar_lea.vmem [#allocation3], %s625_s16 }
  0x26   : > { %s261_s12 = sshll.u32 %s253_s9, 4  ;;  %s259_s27 = sshll.u32 %s258_s6, 4  ;;  %s262_s12 = int_to_ptr.vmem [resolvable:$true] %s261_s12  ;;  %s260_s27 = int_to_ptr.hbm [resolvable:$true] %s259_s27 }
  0x27   : > { %p729_p2 = pnand %p739_p7, %p1143_p3  ;;  %s250_s1 = scalar_lea.sflag [#allocation4], %s249_s15 }
  0x28   : > { %s1020_s2 = smov 128   ;;  %s1021_s3 = smov 8  }
  0x29   : > { %731 = dma.hbm_to_vmem [thread:$0]  (!%p729_p2), %s260_s27, 256, %s262_s12, %s250_s1, %s1020_s2, %s1020_s2, %s1021_s3  }
  0x2a   : > { %273 = sbr.rel (%p1111_p8) target bundleno = 348 (0x15c), region = 40  ;;  %s1169_s10 = sand.u32 (!%p1111_p8), 1, %s997_s19  }
  0x2b   : > { %s629_s11 = sshll.u32 (!%p1111_p8), %s1169_s10, 4  ;;  %s276_s16 = scalar_lea.sflag (!%p1111_p8), [#allocation4], %s1169_s10 }
  0x2c   : > { %s279_s24 = scalar_lea.vmem (!%p1111_p8), [#allocation3], %s629_s11 }
  0x2f   : > { %976 = dma.done.wait (%p1098_p4), %s276_s16, 256  }
  0x30   : > { %978 = vsyncadd (%p1098_p4), %s276_s16, 4294967040 }
  0x31   : > { %980 = dma.done.wait (%p1088_p1), [#allocation7], 272  }
  0x32   : > { %982 = vsyncadd (%p1088_p1), [#allocation7], 4294967024 }
  0x33   : > { %984 = dma.done.wait (%p1088_p1), [#allocation10], 1024  }
  0x34   : > { %986 = vsyncadd (%p1088_p1), [#allocation10], 4294966272  ;;  %v686_v0 = vld [vmem:[#allocation6 + $0x8] sm:$0xff]  ;;  %v685_v1 = vld [vmem:[#allocation6] sm:$0xff]  ;;  %vm358_vm0 = vcmask 261120   ;;  %s696_s3 = sshll.u32 %s1005_s21, 4 }
  0x35   : > { %v335_v2 = vld [vmem:[%s279_s24] sm:$0xff]  ;;  %368 = vmatpush.bf16.msra.mxu0 %v686_v0  ;;  %v336_v4 = vld [vmem:[%s279_s24 + $0x8] sm:$0xff]  ;;  %s487_s8 = scalar_lea.hbm %s1235_s5, %s696_s3  ;;  %s324_s13 = scalar_lea.vmem [#allocation11], %s629_s11 }
  0x36   : > { %v695_v3 = vld [vmem:[#allocation9 + $0x38] sm:$0xff]  ;;  %v694_v5 = vld [vmem:[#allocation9 + $0x30] sm:$0xff]  ;;  %v337_v6 = vpack.c.bf16 %v336_v4, %v335_v2  ;;  %v693_v7 = vld [vmem:[#allocation9 + $0x28] sm:$0xff]  ;;  %s488_s15 = sshll.u32 %s324_s13, 4  ;;  %s490_s25 = sshll.u32 %s487_s8, 4  ;;  %s489_s15 = int_to_ptr.vmem [resolvable:$true] %s488_s15  ;;  %s491_s25 = int_to_ptr.hbm [resolvable:$true] %s490_s25 }
  0x37   : > { %458 = vmatpush.bf16.msra.mxu1 %v695_v3  ;;  %v692_v8 = vld [vmem:[#allocation9 + $0x20] sm:$0xff]  ;;  %v691_v9 = vld [vmem:[#allocation9 + $0x18] sm:$0xff]  ;;  %v690_v10 = vld [vmem:[#allocation9 + $0x10] sm:$0xff]  ;;  %s475_s30 = scalar_lea.sflag [#allocation5], %s1169_s10  ;;  %s937_s6 = sshra.s32 %s491_s25, 4  ;;  %s938_s6 = int_to_ptr.hbm [resolvable:$true] %s937_s6 }
  0x38   : > { %v689_v11 = vld [vmem:[#allocation9 + $0x8] sm:$0xff]  ;;  %v688_v12 = vld [vmem:[#allocation9] sm:$0xff]  ;;  %v801_v14 = vld [vmem:[#allocation8] ss:$0 sm:$0xff]  ;;  %s939_s21 = scalar_lea.hbm %s938_s6, 16  ;;  %s943_s27 = scalar_lea.hbm %s1235_s5, 32 }
  0x39   : > { %369 = vmatpush.bf16.msra.mxu0 %v685_v1  ;;  %v802_v22 = vld [vmem:[%s1234_s4] ss:$0 sm:$0xff]  ;;  %p940_p1 = scmp.ne.s32.totalorder %s938_s6, %s939_s21  ;;  %p944_p10 = scmp.lt.s32.totalorder %s938_s6, %s1235_s5 }
  0x3a   : > { %p945_p12 = scmp.lt.s32.totalorder %s943_s27, %s939_s21 }
  0x3b   : > { %459 = vmatpush.bf16.msra.mxu1 %v694_v5  ;;  %p941_p4 = pnand %p940_p1, %p1149_p5 }
  0x3c   : > { %642 = vmatmul.msk.bf16.vlgmr.msra.gmra.mxu0 %vm358_vm0, %v337_v6  ;;  %p946_p13 = por %p945_p12, %p944_p10 }
  0x3d   : > { %p942_p8 = pneg %p941_p4 }
  0x3f   : > { %460 = vmatpush.bf16.msra.mxu1 %v693_v7  ;;  %p947_p0 = pnand %p946_p13, %p942_p8 }
  0x43   : > { %461 = vmatpush.bf16.msra.mxu1 %v692_v8 }
  0x47   : > { %462 = vmatpush.bf16.msra.mxu1 %v691_v9 }
  0x4b   : > { %463 = vmatpush.bf16.msra.mxu1 %v690_v10 }
  0x4f   : > { %464 = vmatpush.bf16.msra.mxu1 %v689_v11 }
  0x53   : > { %465 = vmatpush.bf16.msra.mxu1 %v688_v12 }
  0xb9   : > { %v371_v13 = vpop.f32.mrf.mxu0 }
  0xba   : > { %v372_v15 = vadd.f32 %v801_v14, %v371_v13 }
  0xbc   : > { %v376_v18 = vmax.f32 %v372_v15, 0.0 }
  0xc1   : > { %v373_v16 = vpop.f32.mrf.mxu0 }
  0xc2   : > { %v374_v17 = vadd.f32 %v801_v14, %v373_v16 }
  0xc4   : > { %v377_v19 = vmax.f32 %v374_v17, 0.0 }
  0xc6   : > { %v700_v20 = vpack.c.bf16 %v377_v19, %v376_v18 }
  0xc8   : > { %701 = vst [vmem:[#allocation2] sm:$0xff] %v700_v20  }
  0xcf   : > { %v687_v21 = vld [vmem:[#allocation2] sm:$0xff] }
  0xd0   : > { %466 = vmatmul.bf16.vlgmr.msra.gmra.mxu1 %v687_v21 }
 0x14d   : > { %v467_v23 = vpop.f32.mrf.mxu1 }
 0x14e   : > { %v468_v24 = vadd.f32 %v802_v22, %v467_v23 }
 0x150   : > { %472 = vst [vmem:[%s324_s13] sm:$0xff] %v468_v24 }
 0x155   : > { %v469_v25 = vpop.f32.mrf.mxu1 }
 0x156   : > { %v470_v26 = vadd.f32 %v802_v22, %v469_v25 }
 0x158   : > { %473 = vst [vmem:[%s324_s13 + $0x8] sm:$0xff] %v470_v26 }
 0x159   : > { %950 = shalt.err (!%p947_p0)
}
 0x15a   : > { %s1022_s10 = smov 128   ;;  %s1023_s24 = smov 8  }
 0x15b   : > { %716 = dma.vmem_to_hbm [thread:$0]  (%p1149_p5), %s489_s15, 256, %s491_s25, %s475_s30, %s1022_s10, %s1022_s10, %s1023_s24  }
 0x15c PF: > { %s505_s1 = sand.u32 1, %s993_s18   ;;  %p733_p3 = pnand %p624_p11, %p1103_p6 }
 0x15d   : > { %s506_s2 = scalar_lea.sflag [#allocation5], %s505_s1 }
 0x15e   : > { %p734_p7 = pneg %p733_p3 }
 0x160   : > { %988 = dma.done.wait (%p734_p7), %s506_s2, 256  }
 0x161   : > { %990 = vsyncadd (%p734_p7), %s506_s2, 4294967040  ;;  %s23_s23 = sadd.s32 1, %s1013_s23   ;;  %s1250_s18 = smov %s997_s19 }
 0x162   : > { %p20_p9 = scmp.ge.s32.totalorder %s23_s23, 4   ;;  %s1251_s19 = smov %s1001_s20 }
 0x163   : > { %s1252_s20 = smov %s1158_s17  ;;  %s1253_s21 = smov %s1009_s22 }
 0x164   : > { %s1254_s22 = smov %s1256_s7  ;;  %22 = sbr.rel (!%p20_p9) target bundleno = 12 (0xc), region = 105 }
 0x169   :  { %512 = vsyncpa [#allocation4], 1 }
 0x16a   :  { %514 = vsyncpa [#allocation4 + $0x1], 1 }
 0x16b   :  { %515 = vsyncpa [#allocation7], 1 }
 0x16c   :  { %516 = vsyncpa [#allocation10], 1 }
 0x16d   :  { %517 = vsyncpa [#allocation5], 1 }
 0x16e   :  { %519 = vsyncpa [#allocation5 + $0x1], 1 }

</bundles_post_ra>
